<compile_context>
chip_gen: v6e
topology: v6e:2x2x1
jax: 0.10.0
libtpu: 0.0.40
codegen_flags: <defaults>
</compile_context>

<pallas_src>
import functools

import jax
import jax.numpy as jnp
from jax.experimental import pallas as pl
from jax.experimental.pallas import tpu as pltpu

LANE = 128


def _round_up(x, m):
    return ((x + m - 1) // m) * m


def _residual_block_kernel(x_ref, w1_ref, w2s_ref, t1_ref, t2s_ref, o_ref, *, L):
    # x_ref  : (RB, Cpin)             bf16   RB = samples_per_step * L (whole samples)
    # w1_ref : (3*Cpin, Cpout)        bf16   conv1 weights, bias/BN folded
    # w2s_ref: (3*Cpout + Cpin, Cpout) bf16  conv2 + 1x1-shortcut weights, folded
    # t1_ref, t2s_ref: (1, Cpout)     f32    folded per-channel shifts
    # o_ref  : (RB, Cpout)            f32
    RB = x_ref.shape[0]

    x = x_ref[...].astype(jnp.float32)                       # (RB, Cpin)

    # Per-sample sequence-boundary masks (rows cover whole samples of length L).
    pos = jax.lax.broadcasted_iota(jnp.int32, (RB, 1), 0) % L
    not_first = pos != 0
    not_last = pos != (L - 1)

    def im2col(v):
        # [v[l-1], v[l], v[l+1]] along the lane-dense channel axis; row shifts
        # via pltpu.roll (XLU), wraparound / cross-sample rows zeroed by the
        # boundary masks (== Conv1d padding=1).
        prev = jnp.where(not_first, pltpu.roll(v, shift=1, axis=0), 0.0)
        nxt = jnp.where(not_last, pltpu.roll(v, shift=RB - 1, axis=0), 0.0)
        return jnp.concatenate([prev, v, nxt], axis=1)        # (RB, 3*C)

    # conv1 (+ folded bias/BN) + ReLU : one bf16 MXU matmul, f32 accumulation.
    h = jnp.dot(im2col(x).astype(jnp.bfloat16), w1_ref[...],
                preferred_element_type=jnp.float32)
    h = jnp.maximum(h + t1_ref[...], 0.0)                     # (RB, Cpout) f32

    # conv2 (+ folded bias/BN) fused with the 1x1 shortcut: one matmul,
    # one folded shift, then residual-combined ReLU epilogue in f32.
    a2 = jnp.concatenate([im2col(h), x], axis=1).astype(jnp.bfloat16)
    out = jnp.dot(a2, w2s_ref[...], preferred_element_type=jnp.float32)
    o_ref[...] = jnp.maximum(out + t2s_ref[...], 0.0).astype(o_ref.dtype)


def residual_block(x_nlc, w1f, w2sf, t1, t2s, c_out):
    """x_nlc: (N, L, Cin) float32. Returns (N, L, c_out) float32."""
    N, L, Cin = x_nlc.shape
    Cpin = w1f.shape[0] // 3
    Cpout = w1f.shape[1]

    # Lane-dense channel pad + bf16 operands; flatten (N, L) to rows.
    x = jnp.pad(x_nlc, ((0, 0), (0, 0), (0, Cpin - Cin))).astype(jnp.bfloat16)
    x_rows = x.reshape(N * L, Cpin)

    # Whole samples per grid step; target ~512 rows/step to amortize overhead.
    nb = max(1, min(N, max(1, 512 // L)))
    while N % nb:
        nb -= 1
    rb = nb * L
    grid = (N // nb,)

    out_rows = pl.pallas_call(
        functools.partial(_residual_block_kernel, L=L),
        out_shape=jax.ShapeDtypeStruct((N * L, Cpout), jnp.float32),
        grid_spec=pltpu.PrefetchScalarGridSpec(
            num_scalar_prefetch=0,
            grid=grid,
            in_specs=[
                pl.BlockSpec((rb, Cpin), lambda i: (i, 0)),    # x rows
                pl.BlockSpec(w1f.shape, lambda i: (0, 0)),     # conv1 folded
                pl.BlockSpec(w2sf.shape, lambda i: (0, 0)),    # conv2+shortcut folded
                pl.BlockSpec(t1.shape, lambda i: (0, 0)),      # shift 1
                pl.BlockSpec(t2s.shape, lambda i: (0, 0)),     # shift 2 (+shortcut)
            ],
            out_specs=pl.BlockSpec((rb, Cpout), lambda i: (i, 0)),
        ),
        compiler_params=pltpu.CompilerParams(
            dimension_semantics=("parallel",)),
    )(x_rows, w1f, w2sf, t1, t2s)

    return out_rows.reshape(N, L, Cpout)[:, :, :c_out]


def fold_params(raw, eps=1e-5):
    """Fold conv bias + inference-mode BN into 128-lane-padded bf16 weights and
    f32 per-channel shifts; fuse conv2 + shortcut weights/shifts."""
    (w1_pt, b1, g1, be1, rm1, rv1,
     w2_pt, b2, g2, be2, rm2, rv2,
     ws_pt, bs, gs, bes, rms, rvs) = raw
    c_out, c_in, _ = w1_pt.shape
    cpin = _round_up(c_in, LANE)
    cpout = _round_up(c_out, LANE)

    def fold(w_pt, b, g, be, rm, rv, cpi, cpo):
        # w_pt: (Cout, Cin, K) PyTorch layout.
        s = g / jnp.sqrt(rv + eps)                           # (Cout,)
        wk = jnp.transpose(w_pt, (2, 1, 0)) * s              # (K, Cin, Cout)
        k, ci, co = wk.shape
        wk = jnp.pad(wk, ((0, 0), (0, cpi - ci), (0, cpo - co)))
        wf = wk.reshape(k * cpi, cpo)                         # (K*Cpin, Cpout)
        tf = jnp.pad(b * s + (be - rm * s), (0, cpo - co))    # (Cpout,)
        return wf, tf

    w1f, t1 = fold(w1_pt, b1, g1, be1, rm1, rv1, cpin, cpout)   # (3*Cpin, Cpout)
    w2f, t2 = fold(w2_pt, b2, g2, be2, rm2, rv2, cpout, cpout)  # (3*Cpout, Cpout)
    wsf, ts = fold(ws_pt, bs, gs, bes, rms, rvs, cpin, cpout)   # (Cpin, Cpout)

    w2sf = jnp.concatenate([w2f, wsf], axis=0)                  # conv2 + shortcut
    t2s = t2 + ts
    return (w1f.astype(jnp.bfloat16), w2sf.astype(jnp.bfloat16),
            t1[None, :].astype(jnp.float32), t2s[None, :].astype(jnp.float32))


def make_raw_params(key, c_in, c_out):
    ks = jax.random.split(key, 12)
    w1_pt = jax.random.normal(ks[0], (c_out, c_in, 3), jnp.float32) * 0.3
    b1 = jax.random.normal(ks[1], (c_out,), jnp.float32) * 0.1
    w2_pt = jax.random.normal(ks[2], (c_out, c_out, 3), jnp.float32) * 0.3
    b2 = jax.random.normal(ks[3], (c_out,), jnp.float32) * 0.1
    ws_pt = jax.random.normal(ks[4], (c_out, c_in, 1), jnp.float32) * 0.3
    bs = jax.random.normal(ks[5], (c_out,), jnp.float32) * 0.1
    # BatchNorm affine params; running stats at nn.BatchNorm1d init: mean=0, var=1
    g1 = 1.0 + 0.1 * jax.random.normal(ks[6], (c_out,), jnp.float32)
    be1 = 0.1 * jax.random.normal(ks[7], (c_out,), jnp.float32)
    g2 = 1.0 + 0.1 * jax.random.normal(ks[8], (c_out,), jnp.float32)
    be2 = 0.1 * jax.random.normal(ks[9], (c_out,), jnp.float32)
    gs = 1.0 + 0.1 * jax.random.normal(ks[10], (c_out,), jnp.float32)
    bes = 0.1 * jax.random.normal(ks[11], (c_out,), jnp.float32)
    rm = jnp.zeros((c_out,), jnp.float32)
    rv = jnp.ones((c_out,), jnp.float32)
    return (w1_pt, b1, g1, be1, rm, rv,
            w2_pt, b2, g2, be2, rm, rv,
            ws_pt, bs, gs, bes, rm, rv)


def reference(x_nlc, raw, eps=1e-5):
    """Pure-JAX f32 reference of the same forward pass (inference-mode BN)."""
    (w1_pt, b1, g1, be1, rm1, rv1,
     w2_pt, b2, g2, be2, rm2, rv2,
     ws_pt, bs, gs, bes, rms, rvs) = raw
    N, L, Cin = x_nlc.shape

    def conv3(h, w_pt, b):                                   # w_pt: (Co, Ci, 3)
        hp = jnp.pad(h, ((0, 0), (1, 1), (0, 0)))
        return sum(jnp.einsum('nlc,oc->nlo', hp[:, k:k + L, :], w_pt[:, :, k])
                   for k in range(3)) + b

    def bn(y, g, be, rm, rv):
        return (y - rm) / jnp.sqrt(rv + eps) * g + be

    h = jnp.maximum(bn(conv3(x_nlc, w1_pt, b1), g1, be1, rm1, rv1), 0.0)
    out = bn(conv3(h, w2_pt, b2), g2, be2, rm2, rv2)
    res = bn(jnp.einsum('nlc,oc->nlo', x_nlc, ws_pt[:, :, 0]) + bs,
             gs, bes, rms, rvs)
    return jnp.maximum(out + res, 0.0)


if __name__ == "__main__":
    key = jax.random.PRNGKey(0)
    kx, kp = jax.random.split(key)

    N, Cin, Cout, L = 2, 4, 8, 16
    x_ncl = jax.random.normal(kx, (N, Cin, L), jnp.float32)   # PyTorch (N, C, L)
    raw = make_raw_params(kp, Cin, Cout)
    w1f, w2sf, t1, t2s = fold_params(raw)

    x_nlc = jnp.transpose(x_ncl, (0, 2, 1))                   # -> (N, L, C)

    out_nlc = jax.block_until_ready(
        residual_block(x_nlc, w1f, w2sf, t1, t2s, Cout))
    out_ncl = jnp.transpose(out_nlc, (0, 2, 1))               # back to (N, C, L)

    ref_nlc = reference(x_nlc, raw)
    assert out_ncl.shape == (N, Cout, L)
    err = float(jnp.max(jnp.abs(out_nlc - ref_nlc)))
    # bf16 matmul operands -> loosened tolerance vs. the f32 reference.
    assert jnp.allclose(out_nlc, ref_nlc, atol=5e-2, rtol=5e-2), err

    print("KERNEL_OK")
</pallas_src>

<mosaic_0001>
module attributes {stable_mosaic.version = 11 : i64} {
  func.func @_residual_block_kernel(%arg0: i32, %arg1: memref<32x128xbf16, #tpu.memory_space<vmem>>, %arg2: memref<384x128xbf16, #tpu.memory_space<vmem>>, %arg3: memref<512x128xbf16, #tpu.memory_space<vmem>>, %arg4: memref<1x128xf32, #tpu.memory_space<vmem>>, %arg5: memref<1x128xf32, #tpu.memory_space<vmem>>, %arg6: memref<32x128xf32, #tpu.memory_space<vmem>>) attributes {dimension_semantics = [#tpu.dimension_semantics<parallel>], iteration_bounds = array<i64: 1>, scalar_prefetch = 0 : i64, scratch_operands = 0 : i64, tpu.core_type = #tpu.core_type<tc>, window_params = [{transform_indices = @transform_0, window_bounds = array<i64: 32, 128>}, {pipeline_mode = #tpu.pipeline_mode<synchronous>, transform_indices = @transform_1, window_bounds = array<i64: 384, 128>}, {pipeline_mode = #tpu.pipeline_mode<synchronous>, transform_indices = @transform_2, window_bounds = array<i64: 512, 128>}, {pipeline_mode = #tpu.pipeline_mode<synchronous>, transform_indices = @transform_3, window_bounds = array<i64: 1, 128>}, {pipeline_mode = #tpu.pipeline_mode<synchronous>, transform_indices = @transform_4, window_bounds = array<i64: 1, 128>}, {transform_indices = @transform_5, window_bounds = array<i64: 32, 128>}]} {
    %c0 = arith.constant 0 : index
    %c0_0 = arith.constant 0 : index
    %0 = vector.load %arg1[%c0, %c0_0] : memref<32x128xbf16, #tpu.memory_space<vmem>>, vector<32x128xbf16>
    %1 = arith.extf %0 : vector<32x128xbf16> to vector<32x128xf32>
    %2 = tpu.iota {dimensions = array<i32: 0>} : vector<32x1xi32>
    %c16_i32 = arith.constant 16 : i32
    %c0_i32 = arith.constant 0 : i32
    %3 = arith.cmpi eq, %c16_i32, %c0_i32 : i32
    %c1_i32 = arith.constant 1 : i32
    %4 = arith.select %3, %c1_i32, %c16_i32 : i32
    %5 = vector.broadcast %4 : i32 to vector<32x1xi32>
    %6 = arith.remsi %2, %5 : vector<32x1xi32>
    %c0_i32_1 = arith.constant 0 : i32
    %7 = vector.broadcast %c0_i32_1 : i32 to vector<32x1xi32>
    %8 = arith.cmpi ne, %6, %7 : vector<32x1xi32>
    %c0_i32_2 = arith.constant 0 : i32
    %9 = vector.broadcast %c0_i32_2 : i32 to vector<32x1xi32>
    %10 = arith.cmpi slt, %6, %9 : vector<32x1xi32>
    %c0_i32_3 = arith.constant 0 : i32
    %11 = arith.cmpi slt, %4, %c0_i32_3 : i32
    %12 = vector.broadcast %11 : i1 to vector<32x1xi1>
    %13 = vector.broadcast %12 : vector<32x1xi1> to vector<32x1xi1>
    %14 = arith.xori %10, %13 : vector<32x1xi1>
    %15 = arith.andi %14, %8 : vector<32x1xi1>
    %16 = vector.broadcast %4 : i32 to vector<32x1xi32>
    %17 = arith.addi %6, %16 : vector<32x1xi32>
    %18 = arith.select %15, %17, %6 : vector<32x1xi1>, vector<32x1xi32>
    %c0_i32_4 = arith.constant 0 : i32
    %19 = vector.broadcast %c0_i32_4 : i32 to vector<32x1xi32>
    %20 = arith.cmpi ne, %18, %19 : vector<32x1xi32>
    %c15_i32 = arith.constant 15 : i32
    %21 = vector.broadcast %c15_i32 : i32 to vector<32x1xi32>
    %22 = arith.cmpi ne, %18, %21 : vector<32x1xi32>
    %c1_i32_5 = arith.constant 1 : i32
    %23 = tpu.dynamic_rotate %1 by %c1_i32_5 dim 0 : vector<32x128xf32>, i32 -> vector<32x128xf32>
    %cst = arith.constant 0.000000e+00 : f32
    %24 = vector.shape_cast %20 : vector<32x1xi1> to vector<32x1xi1>
    %25 = vector.broadcast %24 : vector<32x1xi1> to vector<32x128xi1>
    %26 = vector.broadcast %cst : f32 to vector<32x128xf32>
    %27 = arith.select %25, %23, %26 : vector<32x128xi1>, vector<32x128xf32>
    %c31_i32 = arith.constant 31 : i32
    %28 = tpu.dynamic_rotate %1 by %c31_i32 dim 0 : vector<32x128xf32>, i32 -> vector<32x128xf32>
    %cst_6 = arith.constant 0.000000e+00 : f32
    %29 = vector.shape_cast %22 : vector<32x1xi1> to vector<32x1xi1>
    %30 = vector.broadcast %29 : vector<32x1xi1> to vector<32x128xi1>
    %31 = vector.broadcast %cst_6 : f32 to vector<32x128xf32>
    %32 = arith.select %30, %28, %31 : vector<32x128xi1>, vector<32x128xf32>
    %33 = tpu.concatenate %27, %1, %32 in 1 : vector<32x128xf32>, vector<32x128xf32>, vector<32x128xf32> -> vector<32x384xf32>
    %34 = arith.truncf %33 : vector<32x384xf32> to vector<32x384xbf16>
    %c0_7 = arith.constant 0 : index
    %c0_8 = arith.constant 0 : index
    %35 = vector.load %arg2[%c0_7, %c0_8] : memref<384x128xbf16, #tpu.memory_space<vmem>>, vector<384x128xbf16>
    %cst_9 = arith.constant dense<0.000000e+00> : vector<32x128xf32>
    %36 = tpu.matmul %34, %35, %cst_9 {dimension_numbers = #tpu.dot_dimension_numbers<[1], [0], [0], [1], [0, 0, 1, 1], [], []>} : vector<32x384xbf16>, vector<384x128xbf16>, vector<32x128xf32> -> vector<32x128xf32>
    %c0_10 = arith.constant 0 : index
    %c0_11 = arith.constant 0 : index
    %37 = vector.load %arg4[%c0_10, %c0_11] : memref<1x128xf32, #tpu.memory_space<vmem>>, vector<1x128xf32>
    %38 = vector.broadcast %37 : vector<1x128xf32> to vector<32x128xf32>
    %39 = arith.addf %36, %38 : vector<32x128xf32>
    %cst_12 = arith.constant 0.000000e+00 : f32
    %40 = vector.broadcast %cst_12 : f32 to vector<32x128xf32>
    %41 = arith.maximumf %39, %40 : vector<32x128xf32>
    %c1_i32_13 = arith.constant 1 : i32
    %42 = tpu.dynamic_rotate %41 by %c1_i32_13 dim 0 : vector<32x128xf32>, i32 -> vector<32x128xf32>
    %cst_14 = arith.constant 0.000000e+00 : f32
    %43 = vector.shape_cast %20 : vector<32x1xi1> to vector<32x1xi1>
    %44 = vector.broadcast %43 : vector<32x1xi1> to vector<32x128xi1>
    %45 = vector.broadcast %cst_14 : f32 to vector<32x128xf32>
    %46 = arith.select %44, %42, %45 : vector<32x128xi1>, vector<32x128xf32>
    %c31_i32_15 = arith.constant 31 : i32
    %47 = tpu.dynamic_rotate %41 by %c31_i32_15 dim 0 : vector<32x128xf32>, i32 -> vector<32x128xf32>
    %cst_16 = arith.constant 0.000000e+00 : f32
    %48 = vector.shape_cast %22 : vector<32x1xi1> to vector<32x1xi1>
    %49 = vector.broadcast %48 : vector<32x1xi1> to vector<32x128xi1>
    %50 = vector.broadcast %cst_16 : f32 to vector<32x128xf32>
    %51 = arith.select %49, %47, %50 : vector<32x128xi1>, vector<32x128xf32>
    %52 = tpu.concatenate %46, %41, %51 in 1 : vector<32x128xf32>, vector<32x128xf32>, vector<32x128xf32> -> vector<32x384xf32>
    %53 = tpu.concatenate %52, %1 in 1 : vector<32x384xf32>, vector<32x128xf32> -> vector<32x512xf32>
    %54 = arith.truncf %53 : vector<32x512xf32> to vector<32x512xbf16>
    %c0_17 = arith.constant 0 : index
    %c0_18 = arith.constant 0 : index
    %55 = vector.load %arg3[%c0_17, %c0_18] : memref<512x128xbf16, #tpu.memory_space<vmem>>, vector<512x128xbf16>
    %cst_19 = arith.constant dense<0.000000e+00> : vector<32x128xf32>
    %56 = tpu.matmul %54, %55, %cst_19 {dimension_numbers = #tpu.dot_dimension_numbers<[1], [0], [0], [1], [0, 0, 1, 1], [], []>} : vector<32x512xbf16>, vector<512x128xbf16>, vector<32x128xf32> -> vector<32x128xf32>
    %c0_20 = arith.constant 0 : index
    %c0_21 = arith.constant 0 : index
    %57 = vector.load %arg5[%c0_20, %c0_21] : memref<1x128xf32, #tpu.memory_space<vmem>>, vector<1x128xf32>
    %58 = vector.broadcast %57 : vector<1x128xf32> to vector<32x128xf32>
    %59 = arith.addf %56, %58 : vector<32x128xf32>
    %cst_22 = arith.constant 0.000000e+00 : f32
    %60 = vector.broadcast %cst_22 : f32 to vector<32x128xf32>
    %61 = arith.maximumf %59, %60 : vector<32x128xf32>
    %c0_23 = arith.constant 0 : index
    %c0_24 = arith.constant 0 : index
    %62 = vector.load %arg6[%c0_23, %c0_24] : memref<32x128xf32, #tpu.memory_space<vmem>>, vector<32x128xf32>
    tpu.vector_store %arg6[%c0_23, %c0_24], %61 {strides = array<i32>} : memref<32x128xf32, #tpu.memory_space<vmem>>, vector<32x128xf32>,
    return
  }
  func.func @transform_0(%arg0: i32) -> (i32, i32) {
    %c0_i32 = arith.constant 0 : i32
    %c0_i32_0 = arith.constant 0 : i32
    return %arg0, %c0_i32 : i32, i32
  }
  func.func @transform_1(%arg0: i32) -> (i32, i32) {
    %c0_i32 = arith.constant 0 : i32
    %c0_i32_0 = arith.constant 0 : i32
    %c0_i32_1 = arith.constant 0 : i32
    return %c0_i32, %c0_i32_0 : i32, i32
  }
  func.func @transform_2(%arg0: i32) -> (i32, i32) {
    %c0_i32 = arith.constant 0 : i32
    %c0_i32_0 = arith.constant 0 : i32
    %c0_i32_1 = arith.constant 0 : i32
    return %c0_i32, %c0_i32_0 : i32, i32
  }
  func.func @transform_3(%arg0: i32) -> (i32, i32) {
    %c0_i32 = arith.constant 0 : i32
    %c0_i32_0 = arith.constant 0 : i32
    %c0_i32_1 = arith.constant 0 : i32
    return %c0_i32, %c0_i32_0 : i32, i32
  }
  func.func @transform_4(%arg0: i32) -> (i32, i32) {
    %c0_i32 = arith.constant 0 : i32
    %c0_i32_0 = arith.constant 0 : i32
    %c0_i32_1 = arith.constant 0 : i32
    return %c0_i32, %c0_i32_0 : i32, i32
  }
  func.func @transform_5(%arg0: i32) -> (i32, i32) {
    %c0_i32 = arith.constant 0 : i32
    %c0_i32_0 = arith.constant 0 : i32
    return %arg0, %c0_i32 : i32, i32
  }
}

</mosaic_0001>

<bundles_post_ra>
// kernel: tpu_custom_call.1
= control target key start
LH: loop header
LB: loop body
LE: loop exit
PB: predicated region body
PF: predicated region fallthrough
CT: control target
= control target key end

     0   :  { %10 = vsyncpa [#allocation3], 0  ;;  %s1414_s0 = inlined_call_operand.hbm [shape: bf16[32,128], index: 0, kind: input, shape index: {}]   ;;  %s1415_s1 = inlined_call_operand.hbm [shape: bf16[384,128], index: 1, kind: input, shape index: {}]   ;;  %s1416_s2 = inlined_call_operand.hbm [shape: bf16[512,128], index: 2, kind: input, shape index: {}]   ;;  %s1417_s3 = inlined_call_operand.vmem [shape: f32[1,128], index: 3, kind: input, shape index: {}]   ;;  %s1418_s4 = inlined_call_operand.vmem [shape: f32[1,128], index: 4, kind: input, shape index: {}]   ;;  %s1419_s5 = inlined_call_operand.hbm [shape: f32[32,128], index: 5, kind: output, shape index: {}]  }
   0x1   :  { %11 = vsyncpa [#allocation6], 0 }
   0x2   :  { %12 = vsyncpa [#allocation4], 0  ;;  %s1251_s18 = smov [#allocation5]   ;;  %s1252_s20 = smov [#allocation2]  }
   0x3   :  { %s30_s19 = sshll.u32 %s1251_s18, 4  ;;  %s18_s21 = sshll.u32 %s1252_s20, 4  ;;  %s31_s19 = int_to_ptr.vmem [resolvable:$true] %s30_s19  ;;  %s19_s21 = int_to_ptr.vmem [resolvable:$true] %s18_s21 }
   0x4   :  { %s1173_s22 = scalar_lea.vmem %s31_s19, 3072  ;;  %p1178_p1 = scmp.lt.s32.totalorder %s31_s19, %s31_s19 }
   0x5   :  { %p1174_p0 = scmp.ne.s32.totalorder %s31_s19, %s1173_s22  ;;  %p1179_p2 = scmp.lt.s32.totalorder %s1173_s22, %s1173_s22 }
   0x7   :  { %p1180_p3 = por %p1179_p2, %p1178_p1 }
   0x9   :  { %p1181_p4 = pnand %p1180_p3, %p1174_p0 }
   0xb   :  { %1184 = shalt.err (!%p1181_p4)
}
   0xc   :  { %s1253_s23 = smov 64   ;;  %s1254_s24 = smov 4  }
   0xd   :  { %36 = dma.hbm_to_vmem [thread:$0]  %s1415_s1, 3072, %s31_s19, [#allocation6], %s1253_s23, %s1253_s23, %s1254_s24  }
   0xe   :  { %s1193_s27 = scalar_lea.vmem %s19_s21, 256  ;;  %p1198_p6 = scmp.lt.s32.totalorder %s19_s21, %s19_s21 }
   0xf   :  { %p1194_p5 = scmp.ne.s32.totalorder %s19_s21, %s1193_s27  ;;  %p1199_p7 = scmp.lt.s32.totalorder %s1193_s27, %s1193_s27 }
  0x11   :  { %p1200_p8 = por %p1199_p7, %p1198_p6 }
  0x13   :  { %p1201_p9 = pnand %p1200_p8, %p1194_p5 }
  0x15   :  { %1204 = shalt.err (!%p1201_p9)
}
  0x16   :  { %24 = dma.hbm_to_vmem [thread:$0]  %s1414_s0, 256, %s19_s21, [#allocation3], %s1253_s23, %s1253_s23, %s1254_s24  }
  0x17   :  { %s1255_s30 = smov [#allocation7]  }
  0x18   :  { %s42_s6 = sshll.u32 %s1255_s30, 4  ;;  %s43_s6 = int_to_ptr.vmem [resolvable:$true] %s42_s6 }
  0x19   :  { %s1213_s7 = scalar_lea.vmem %s43_s6, 4096  ;;  %p1218_p11 = scmp.lt.s32.totalorder %s43_s6, %s43_s6 }
  0x1a   :  { %p1214_p10 = scmp.ne.s32.totalorder %s43_s6, %s1213_s7  ;;  %p1219_p12 = scmp.lt.s32.totalorder %s1213_s7, %s1213_s7 }
  0x1c   :  { %p1220_p13 = por %p1219_p12, %p1218_p11 }
  0x1e   :  { %p1221_p0 = pnand %p1220_p13, %p1214_p10 }
  0x20   :  { %1224 = shalt.err (!%p1221_p0)
}
  0x21   :  { %48 = dma.hbm_to_vmem [thread:$0]  %s1416_s2, 4096, %s43_s6, [#allocation6], %s1253_s23, %s1253_s23, %s1254_s24  }
  0x22   :  { %1245 = dma.done.wait [#allocation3], 256  }
  0x23   :  { %1246 = vsyncadd [#allocation3], 4294967040 }
  0x24   :  { %1247 = dma.done.wait [#allocation6], 7168  }
  0x25   :  { %1248 = vsyncadd [#allocation6], 4294960128  ;;  %v1105_v0 = vld [vmem:[#allocation5 + $0x78] sm:$0xff]   ;;  %v1107_v2 = vld [vmem:[#allocation5 + $0x70] sm:$0xff]   ;;  %v71_v7 = vlaneseq  ;;  %vm1256_vm4 = vmmov 1  }
  0x26   :  { %v1106_v1 = vld [vmem:[#allocation5 + $0x38] sm:$0xff]   ;;  %982 = vmatprep.subr.bf16.mxu0 %v1105_v0  ;;  %v1109_v4 = vld [vmem:[#allocation5 + $0x30] sm:$0xff]   ;;  %v1110_v5 = vld [vmem:[#allocation5 + $0x68] sm:$0xff]  }
  0x27   :  { %983 = vmatpush3.bf16.msra.mxu0 %v1106_v1  ;;  %v1108_v3 = vld [vmem:[#allocation5 + $0xb8] sm:$0xff]   ;;  %v1111_v6 = vld [vmem:[#allocation5 + $0xb0] sm:$0xff]   ;;  %v1112_v8 = vld [vmem:[#allocation5 + $0x28] sm:$0xff]   ;;  %v1299_v12 = vshrl.u32 %v71_v7, 7 }
  0x28   :  { %984 = vmatprep.subr.bf16.mxu0 %v1107_v2  ;;  %1076 = vmatprep.subr.bf16.mxu1 %v1108_v3  ;;  %v1113_v9 = vld [vmem:[#allocation5 + $0x60] sm:$0xff]   ;;  %v1114_v10 = vld [vmem:[#allocation5 + $0xa8] sm:$0xff]   ;;  %v1116_v13 = vld [vmem:[#allocation5 + $0x58] sm:$0xff]  }
  0x29   :  { %1077 = vmatpush3.bf16.msra.mxu1 %v1108_v3  ;;  %v1115_v11 = vld [vmem:[#allocation5 + $0x20] sm:$0xff]   ;;  %v1118_v15 = vld [vmem:[#allocation5 + $0x18] sm:$0xff]   ;;  %v73_v16 = vadd.s32 8, %v1299_v12  ;;  %v75_v18 = vadd.s32 24, %v1299_v12  ;;  %v1119_v19 = vld [vmem:[#allocation5 + $0x50] sm:$0xff]   ;;  %v80_v20 = vand.u32 15, %v1299_v12 }
  0x2a   :  { %1078 = vmatprep.subr.bf16.mxu1 %v1111_v6  ;;  %v1117_v14 = vld [vmem:[#allocation5 + $0xa0] sm:$0xff]   ;;  %v1120_v17 = vld [vmem:[#allocation5 + $0x98] sm:$0xff]   ;;  %v74_v21 = vadd.s32 16, %v1299_v12  ;;  %v1121_v22 = vld [vmem:[#allocation5 + $0x10] sm:$0xff]   ;;  %vm136_vm1 = vcmp.lt.s32.totalorder %v1299_v12, 1  ;;  %vm157_vm6 = vcmp.lt.s32.totalorder %v1299_v12, 7 }
  0x2b   :  { %985 = vmatpush3.bf16.msra.mxu0 %v1109_v4  ;;  %v87_v23 = vand.u32 15, %v73_v16  ;;  %v1123_v24 = vld [vmem:[#allocation5 + $0x90] sm:$0xff]   ;;  %v101_v25 = vand.u32 15, %v75_v18  ;;  %v1122_v26 = vld [vmem:[#allocation5 + $0x48] sm:$0xff]   ;;  %vm1305_vm0 = vcmp.ne.s32.totalorder %v80_v20, 0  ;;  %v1309_v32 = vld [vmem:[#allocation2 + $0x8] sm:$0xff]  }
  0x2c   :  { %986 = vmatprep.subr.bf16.mxu0 %v1110_v5  ;;  %v94_v27 = vand.u32 15, %v74_v21  ;;  %v1124_v28 = vld [vmem:[#allocation5 + $0x8] sm:$0xff]   ;;  %v63_v31 = vld [vmem:[#allocation2] sm:$0xff]   ;;  %v1125_v35 = vld [vmem:[#allocation5 + $0x40] sm:$0xff]   ;;  %v70_v38 = vunpack.c.h.bf16 %v1309_v32  ;;  %v69_v40 = vunpack.c.l.bf16 %v1309_v32 }
  0x2d   :  { %1079 = vmatpush3.bf16.msra.mxu1 %v1111_v6  ;;  %v1126_v30 = vld [vmem:[#allocation5 + $0x88] sm:$0xff]   ;;  %vm1312_vm2 = vcmp.ne.s32.totalorder %v87_v23, 15  ;;  %vm1316_vm3 = vcmp.ne.s32.totalorder %v101_v25, 15  ;;  %v67_v36 = vunpack.c.l.bf16 %v63_v31  ;;  %v68_v37 = vunpack.c.h.bf16 %v63_v31  ;;  %vm1324_vm5 = vmpackc.low %vm1256_vm4, %vm1305_vm0  ;;  %v1127_v42 = vld [vmem:[#allocation5] sm:$0xff]   ;;  %411 = vmatprep.mubr.bf16.mxu0 %v63_v31 }
  0x2e   :  { %1080 = vmatprep.subr.bf16.mxu1 %v1114_v10  ;;  %vm1330_vm7 = vcmp.ne.s32.totalorder %v94_v27, 0  ;;  %vm1337_vm8 = vmpackc.low %vm1312_vm2, %vm1256_vm4  ;;  %v135_v48 = vrot.slane %v70_v38, 7  ;;  %v1129_v49 = vld [vmem:[#allocation5 + $0x80] sm:$0xff]   ;;  %v155_v50 = vrot.slane %v69_v40, 1  ;;  %v156_v51 = vrot.slane %v70_v38, 1  ;;  %v1133_v57 = vld [vmem:[#allocation7 + $0x78] sm:$0xff]  }
  0x2f   :  { %987 = vmatpush3.bf16.msra.mxu0 %v1112_v8  ;;  %v132_v43 = vrot.slane %v67_v36, 7  ;;  %v133_v44 = vrot.slane %v68_v37, 7  ;;  %v153_v45 = vrot.slane %v67_v36, 1  ;;  %v154_v46 = vrot.slane %v68_v37, 1  ;;  %vm1344_vm9 = vmpackc.low %vm1316_vm3, %vm1256_vm4  ;;  %v1131_v62 = vld [vmem:[#allocation7 + $0xf8] sm:$0xff]   ;;  %v1134_v4 = vld [vmem:[#allocation7 + $0xf0] sm:$0xff]  }
  0x30   :  { %988 = vmatprep.subr.bf16.mxu0 %v1113_v9  ;;  %v158_v60 = vsel %vm157_vm6, %v155_v50, %v156_v51  ;;  %v134_v63 = vrot.slane %v69_v40, 7  ;;  %vm1363_vm10 = vmpackc.low %vm1256_vm4, %vm1330_vm7  ;;  %v1132_v1 = vld [vmem:[#allocation7 + $0xb8] sm:$0xff]   ;;  %v1136_v7 = vld [vmem:[#allocation7 + $0xb0] sm:$0xff]  }
  0x31   :  { %1081 = vmatpush3.bf16.msra.mxu1 %v1114_v10  ;;  %v139_v53 = vsel %vm136_vm1, %v132_v43, %v133_v44  ;;  %v160_v54 = vsel %vm157_vm6, %v153_v45, %v154_v46  ;;  %v140_v55 = vsel %vm136_vm1, %v135_v48, %v132_v43  ;;  %v159_v56 = vsel %vm157_vm6, %v154_v46, %v155_v50  ;;  %v1135_v2 = vld [vmem:[#allocation7 + $0x38] sm:$0xff]   ;;  %v1137_v9 = vld [vmem:[#allocation7 + $0x70] sm:$0xff]   ;;  %v1138_v10 = vld [vmem:[#allocation7 + $0xe8] sm:$0xff]  }
  0x32   :  { %1082 = vmatprep.subr.bf16.mxu1 %v1117_v14  ;;  %v926_v58 = vpack.c.bf16 %v139_v53, %v140_v55  ;;  %v932_v59 = vpack.c.bf16 %v159_v56, %v160_v54  ;;  %v161_v61 = vsel %vm157_vm6, %v156_v51, %v153_v45  ;;  %v137_v5 = vsel %vm136_vm1, %v134_v63, %v135_v48  ;;  %v1143_v16 = vld [vmem:[#allocation7 + $0x28] sm:$0xff]   ;;  %v1145_v18 = vld [vmem:[#allocation7 + $0x60] sm:$0xff]   ;;  %v1148_v21 = vld [vmem:[#allocation7 + $0x98] sm:$0xff]  }
  0x33   :  { %989 = vmatpush3.bf16.msra.mxu0 %v1115_v11  ;;  %v935_v3 = vpack.c.bf16 %v161_v61, %v158_v60  ;;  %v138_v6 = vsel %vm136_vm1, %v133_v44, %v134_v63  ;;  %v1139_v11 = vld [vmem:[#allocation7 + $0x30] sm:$0xff]   ;;  %v1147_v20 = vld [vmem:[#allocation7 + $0x20] sm:$0xff]   ;;  %v1154_v27 = vld [vmem:[#allocation7 + $0xc8] sm:$0xff]  }
  0x34   :  { %990 = vmatprep.subr.bf16.mxu0 %v1116_v13  ;;  %1092 = vmatprep.mubr.msk.bf16.mxu1 %vm1337_vm8, %v932_v59  ;;  %v929_v8 = vpack.c.bf16 %v137_v5, %v138_v6  ;;  %v1140_v13 = vld [vmem:[#allocation7 + $0xa8] sm:$0xff]   ;;  %v1150_v23 = vld [vmem:[#allocation7 + $0xd0] sm:$0xff]   ;;  %v1160_v34 = vld [vmem:[#allocation7 + $0x80] sm:$0xff]  }
  0x35   :  { %1083 = vmatpush3.bf16.msra.mxu1 %v1117_v14  ;;  %v1141_v14 = vld [vmem:[#allocation7 + $0x68] sm:$0xff]   ;;  %v1152_v25 = vld [vmem:[#allocation7 + $0x90] sm:$0xff]   ;;  %v1162_v36 = vld [vmem:[#allocation7] sm:$0xff]  }
  0x36   :  { %1084 = vmatprep.subr.bf16.mxu1 %v1120_v17  ;;  %v1156_v29 = vld [vmem:[#allocation7 + $0x88] sm:$0xff]  }
  0x37   :  { %991 = vmatpush3.bf16.msra.mxu0 %v1118_v15  ;;  %v1142_v15 = vld [vmem:[#allocation7 + $0xe0] sm:$0xff]   ;;  %v1159_v33 = vld [vmem:[#allocation7 + $0x8] sm:$0xff]  }
  0x38   :  { %992 = vmatprep.subr.bf16.mxu0 %v1119_v19  ;;  %v1146_v19 = vld [vmem:[#allocation7 + $0xd8] sm:$0xff]  }
  0x39   :  { %1085 = vmatpush3.bf16.msra.mxu1 %v1120_v17  ;;  %v1144_v17 = vld [vmem:[#allocation7 + $0xa0] sm:$0xff]  }
  0x3a   :  { %1086 = vmatprep.subr.bf16.mxu1 %v1123_v24 }
  0x3b   :  { %993 = vmatpush3.bf16.msra.mxu0 %v1121_v22  ;;  %v1149_v22 = vld [vmem:[#allocation7 + $0x58] sm:$0xff]  }
  0x3c   :  { %994 = vmatprep.subr.bf16.mxu0 %v1122_v26  ;;  %v1153_v26 = vld [vmem:[#allocation7 + $0x50] sm:$0xff]  }
  0x3d   :  { %1087 = vmatpush3.bf16.msra.mxu1 %v1123_v24  ;;  %v1151_v24 = vld [vmem:[#allocation7 + $0x18] sm:$0xff]  }
  0x3e   :  { %1088 = vmatprep.subr.bf16.mxu1 %v1126_v30 }
  0x3f   :  { %995 = vmatpush3.bf16.msra.mxu0 %v1124_v28  ;;  %v1155_v28 = vld [vmem:[#allocation7 + $0x10] sm:$0xff]  }
  0x40   :  { %996 = vmatprep.subr.bf16.mxu0 %v1125_v35  ;;  %v1161_v35 = vld [vmem:[#allocation7 + $0x40] sm:$0xff]  }
  0x41   :  { %1089 = vmatpush3.bf16.msra.mxu1 %v1126_v30  ;;  %v1157_v30 = vld [vmem:[#allocation7 + $0x48] sm:$0xff]  }
  0x42   :  { %1090 = vmatprep.subr.bf16.mxu1 %v1129_v49 }
  0x43   :  { %997 = vmatpush3.bf16.msra.mxu0 %v1127_v42  ;;  %v900_v42 = vld [vmem:[%s1417_s3] ss:$0 sm:$0xff] }
  0x44   :  { %1020 = vmatprep.subr.bf16.mxu0 %v1133_v57 }
  0x45   :  { %1091 = vmatpush3.bf16.msra.mxu1 %v1129_v49 }
  0x46   :  { %927 = vmatmul.mubr.msk.bf16.vlgmr.msra.gmra.mxu0 %vm1324_vm5, %v926_v58  ;;  %1048 = vmatprep.subr.bf16.mxu1 %v1131_v62 }
  0x47   :  { %419 = vmatprep.mubr.bf16.mxu0 %v1309_v32  ;;  %1021 = vmatpush3.bf16.msra.mxu0 %v1135_v2 }
  0x48   :  { %1093 = vmatmul.mubr.msk.bf16.vlgmr.msra.gmra.mxu1 %vm1344_vm9, %v935_v3  ;;  %1022 = vmatprep.subr.bf16.mxu0 %v1137_v9 }
  0x49   :  { %1049 = vmatpush3.bf16.msra.mxu1 %v1132_v1  ;;  %855 = vmatprep.mubr.bf16.mxu1 %v63_v31  ;;  %v1158_v31 = vld [vmem:[#allocation7 + $0xc0] sm:$0xff]  }
  0x4a   :  { %1050 = vmatprep.subr.bf16.mxu1 %v1134_v4 }
  0x4b   :  { %1023 = vmatpush3.bf16.msra.mxu0 %v1139_v11 }
  0x4c   :  { %1024 = vmatprep.subr.bf16.mxu0 %v1141_v14 }
  0x4d   :  { %1051 = vmatpush3.bf16.msra.mxu1 %v1136_v7 }
  0x4e   :  { %930 = vmatmul.mubr.msk.bf16.gmra.mxu0 %vm1363_vm10, %v929_v8  ;;  %1052 = vmatprep.subr.bf16.mxu1 %v1138_v10 }
  0x4f   :  { %1025 = vmatpush3.bf16.msra.mxu0 %v1143_v16 }
  0x50   :  { %1026 = vmatprep.subr.bf16.mxu0 %v1145_v18 }
  0x51   :  { %1053 = vmatpush3.bf16.msra.mxu1 %v1140_v13 }
  0x52   :  { %1054 = vmatprep.subr.bf16.mxu1 %v1142_v15 }
  0x53   :  { %1027 = vmatpush3.bf16.msra.mxu0 %v1147_v20 }
  0x54   :  { %1028 = vmatprep.subr.bf16.mxu0 %v1149_v22 }
  0x55   :  { %1055 = vmatpush3.bf16.msra.mxu1 %v1144_v17 }
  0x56   :  { %1056 = vmatprep.subr.bf16.mxu1 %v1146_v19 }
  0x57   :  { %1029 = vmatpush3.bf16.msra.mxu0 %v1151_v24 }
  0x58   :  { %1030 = vmatprep.subr.bf16.mxu0 %v1153_v26 }
  0x59   :  { %1057 = vmatpush3.bf16.msra.mxu1 %v1148_v21 }
  0x5a   :  { %1058 = vmatprep.subr.bf16.mxu1 %v1150_v23 }
  0x5b   :  { %1031 = vmatpush3.bf16.msra.mxu0 %v1155_v28 }
  0x5c   :  { %1032 = vmatprep.subr.bf16.mxu0 %v1157_v30  ;;  %v937_v30 = vld [vmem:[%s1418_s4] ss:$0 sm:$0xff]  ;;  %s1257_s4 = smov [#allocation8]  }
  0x5d   :  { %1059 = vmatpush3.bf16.msra.mxu1 %v1152_v25  ;;  %s885_s10 = sshll.u32 %s1257_s4, 4  ;;  %s886_s10 = int_to_ptr.vmem [resolvable:$true] %s885_s10 }
  0x5e   :  { %1060 = vmatprep.subr.bf16.mxu1 %v1154_v27  ;;  %s1225_s11 = scalar_lea.vmem %s886_s10, 512  ;;  %p1230_p2 = scmp.lt.s32.totalorder %s886_s10, %s886_s10 }
  0x5f   :  { %1033 = vmatpush3.bf16.msra.mxu0 %v1159_v33  ;;  %p1226_p1 = scmp.ne.s32.totalorder %s886_s10, %s1225_s11  ;;  %p1231_p3 = scmp.lt.s32.totalorder %s1225_s11, %s1225_s11 }
  0x60   :  { %1034 = vmatprep.subr.bf16.mxu0 %v1161_v35 }
  0x61   :  { %1061 = vmatpush3.bf16.msra.mxu1 %v1156_v29  ;;  %p1232_p4 = por %p1231_p3, %p1230_p2 }
  0x62   :  { %1062 = vmatprep.subr.bf16.mxu1 %v1158_v31 }
  0x63   :  { %1035 = vmatpush3.bf16.msra.mxu0 %v1162_v36  ;;  %p1233_p5 = pnand %p1232_p4, %p1226_p1 }
  0x65   :  { %1063 = vmatpush3.bf16.msra.mxu1 %v1160_v34 }
 0x106   :  { %v998_v37 = vpop.f32.mrf.mxu0 }
 0x108   :  { %v999_v38 = vpop.f32.mrf.mxu0  ;;  %v1094_v41 = vpop.f32.mrf.mxu1 }
 0x109   :  { %v1000_v40 = vadd.f32 %v999_v38, %v998_v37 }
 0x10a   :  { %v1001_v43 = vpop.f32.mrf.mxu0  ;;  %v462_v44 = vpop.f32.mrf.mxu1 }
 0x10b   :  { %v414_v46 = vadd.f32 %v1000_v40, %v900_v42 }
 0x10c   :  { %v1002_v45 = vpop.f32.mrf.mxu0  ;;  %v1095_v49 = vpop.f32.mrf.mxu1 }
 0x10d   :  { %v1003_v48 = vadd.f32 %v1002_v45, %v1001_v43  ;;  %v463_v54 = vadd.f32 %v462_v44, %v414_v46 }
 0x10e   :  { %v1004_v50 = vpop.f32.mrf.mxu0  ;;  %v465_v53 = vpop.f32.mrf.mxu1 }
 0x10f   :  { %v417_v51 = vadd.f32 %v1003_v48, %v900_v42  ;;  %v477_v61 = vmax.f32 %v463_v54, 0.0 }
 0x110   :  { %v1005_v55 = vpop.f32.mrf.mxu0 }
 0x111   :  { %v1006_v56 = vadd.f32 %v1005_v55, %v1004_v50  ;;  %v466_v57 = vadd.f32 %v465_v53, %v417_v51  ;;  %v493_v6 = vrot.slane %v477_v61, 1  ;;  %v481_v15 = vrot.slane %v477_v61, 7 }
 0x112   :  { %v1007_v58 = vpop.f32.mrf.mxu0 }
 0x113   :  { %v422_v59 = vadd.f32 %v1006_v56, %v900_v42  ;;  %v478_v60 = vmax.f32 %v466_v57, 0.0 }
 0x114   :  { %v1008_v62 = vpop.f32.mrf.mxu0 }
 0x115   :  { %v471_v63 = vadd.f32 %v1094_v41, %v422_v59  ;;  %v1009_v1 = vadd.f32 %v1008_v62, %v1007_v58  ;;  %v506_v2 = vpack.c.bf16 %v478_v60, %v477_v61  ;;  %v494_v4 = vrot.slane %v478_v60, 1 }
 0x116   :  { %v482_v9 = vrot.slane %v478_v60, 7 }
 0x117   :  { %v479_v3 = vmax.f32 %v471_v63, 0.0  ;;  %v425_v5 = vadd.f32 %v1009_v1, %v900_v42  ;;  %806 = vmatprep.mubr.bf16.mxu0 %v506_v2  ;;  %v499_v11 = vsel %vm157_vm6, %v493_v6, %v494_v4 }
 0x118   :  { %v487_v18 = vsel %vm136_vm1, %v481_v15, %v482_v9 }
 0x119   :  { %v495_v7 = vrot.slane %v479_v3, 1  ;;  %v474_v8 = vadd.f32 %v1095_v49, %v425_v5  ;;  %v483_v47 = vrot.slane %v479_v3, 7 }
 0x11b   :  { %v498_v10 = vsel %vm157_vm6, %v494_v4, %v495_v7  ;;  %v480_v13 = vmax.f32 %v474_v8, 0.0 }
 0x11c   :  { %v977_v14 = vpack.c.bf16 %v498_v10, %v499_v11 }
 0x11d   :  { %v484_v16 = vrot.slane %v480_v13, 7  ;;  %v496_v17 = vrot.slane %v480_v13, 1  ;;  %v509_v21 = vpack.c.bf16 %v480_v13, %v479_v3 }
 0x11e   :  { %978 = vmatmul.mubr.msk.bf16.vlgmr.msra.gmra.mxu1 %vm1337_vm8, %v977_v14 }
 0x11f   :  { %v488_v19 = vsel %vm136_vm1, %v484_v16, %v481_v15  ;;  %863 = vmatprep.mubr.bf16.mxu1 %v1309_v32  ;;  %v497_v22 = vsel %vm157_vm6, %v495_v7, %v496_v17  ;;  %v500_v23 = vsel %vm157_vm6, %v496_v17, %v493_v6  ;;  %v485_v25 = vsel %vm136_vm1, %v483_v47, %v484_v16 }
 0x120   :  { %v971_v20 = vpack.c.bf16 %v487_v18, %v488_v19  ;;  %v980_v24 = vpack.c.bf16 %v500_v23, %v497_v22  ;;  %v486_v32 = vsel %vm136_vm1, %v482_v9, %v483_v47 }
 0x121   :  { %v974_v26 = vpack.c.bf16 %v485_v25, %v486_v32 }
 0x122   :  { %972 = vmatmul.mubr.msk.bf16.vlgmr.msra.gmra.mxu0 %vm1324_vm5, %v971_v20 }
 0x123   :  { %814 = vmatprep.mubr.bf16.mxu0 %v509_v21 }
 0x126   :  { %981 = vmatmul.mubr.msk.bf16.gmra.mxu1 %vm1344_vm9, %v980_v24 }
 0x12a   :  { %975 = vmatmul.mubr.msk.bf16.gmra.mxu0 %vm1363_vm10, %v974_v26 }
 0x1de   :  { %v1064_v27 = vpop.f32.mrf.mxu1 }
 0x1e0   :  { %v1065_v28 = vpop.f32.mrf.mxu1 }
 0x1e1   :  { %v1066_v36 = vadd.f32 %v1065_v28, %v1064_v27 }
 0x1e2   :  { %v1036_v39 = vpop.f32.mrf.mxu0  ;;  %v1067_v29 = vpop.f32.mrf.mxu1 }
 0x1e4   :  { %v1037_v31 = vpop.f32.mrf.mxu0  ;;  %v1068_v33 = vpop.f32.mrf.mxu1 }
 0x1e5   :  { %v1038_v34 = vadd.f32 %v1037_v31, %v1036_v39  ;;  %v1069_v43 = vadd.f32 %v1068_v33, %v1067_v29 }
 0x1e6   :  { %v1039_v52 = vpop.f32.mrf.mxu0  ;;  %v1070_v35 = vpop.f32.mrf.mxu1 }
 0x1e7   :  { %v809_v12 = vadd.f32 %v1038_v34, %v937_v30 }
 0x1e8   :  { %v1040_v37 = vpop.f32.mrf.mxu0  ;;  %v1071_v38 = vpop.f32.mrf.mxu1 }
 0x1e9   :  { %v858_v40 = vadd.f32 %v1066_v36, %v809_v12  ;;  %v1041_v0 = vadd.f32 %v1040_v37, %v1039_v52  ;;  %v1072_v53 = vadd.f32 %v1071_v38, %v1070_v35 }
 0x1ea   :  { %v1042_v41 = vpop.f32.mrf.mxu0  ;;  %v1073_v45 = vpop.f32.mrf.mxu1 }
 0x1eb   :  { %v872_v42 = vmax.f32 %v858_v40, 0.0  ;;  %v812_v44 = vadd.f32 %v1041_v0, %v937_v30 }
 0x1ec   :  { %v1043_v46 = vpop.f32.mrf.mxu0  ;;  %v1074_v55 = vpop.f32.mrf.mxu1 }
 0x1ed   :  { %876 = vst [vmem:[#allocation8] sm:$0xff] %v872_v42  ;;  %v861_v48 = vadd.f32 %v1069_v43, %v812_v44  ;;  %v1044_v49 = vadd.f32 %v1043_v46, %v1042_v41  ;;  %v1075_v60 = vadd.f32 %v1074_v55, %v1073_v45 }
 0x1ee   :  { %v1045_v50 = vpop.f32.mrf.mxu0 }
 0x1ef   :  { %v873_v51 = vmax.f32 %v861_v48, 0.0  ;;  %v817_v54 = vadd.f32 %v1044_v49, %v937_v30 }
 0x1f0   :  { %v1046_v56 = vpop.f32.mrf.mxu0 }
 0x1f1   :  { %877 = vst [vmem:[#allocation8 + $0x8] sm:$0xff] %v873_v51  ;;  %v866_v57 = vadd.f32 %v1072_v53, %v817_v54  ;;  %v1047_v58 = vadd.f32 %v1046_v56, %v1045_v50 }
 0x1f3   :  { %v874_v59 = vmax.f32 %v866_v57, 0.0  ;;  %v820_v61 = vadd.f32 %v1047_v58, %v937_v30 }
 0x1f5   :  { %878 = vst [vmem:[#allocation8 + $0x10] sm:$0xff] %v874_v59  ;;  %v869_v62 = vadd.f32 %v1075_v60, %v820_v61 }
 0x1f7   :  { %v875_v63 = vmax.f32 %v869_v62, 0.0 }
 0x1f9   :  { %879 = vst [vmem:[#allocation8 + $0x18] sm:$0xff] %v875_v63 }
 0x1fa   :  { %1236 = shalt.err (!%p1233_p5)
}
 0x1fb   :  { %s1258_s12 = smov 128   ;;  %s1259_s13 = smov 8  }
 0x1fc   :  { %891 = dma.vmem_to_hbm [thread:$0]  %s886_s10, 512, %s1419_s5, [#allocation4], %s1258_s12, %s1258_s12, %s1259_s13  }
 0x1fd   :  { %1249 = dma.done.wait [#allocation4], 512  }
 0x1fe   :  { %1250 = vsyncadd [#allocation4], 4294966784 }
 0x1ff   :  { %895 = vsyncpa [#allocation3], 1 }
 0x200   :  { %896 = vsyncpa [#allocation6], 1 }
 0x201   :  { %897 = vsyncpa [#allocation4], 1 }

</bundles_post_ra>
